<compile_context>
chip_gen: v6e
topology: v6e:2x2x1
jax: 0.10.0
libtpu: 0.0.40
codegen_flags: <defaults>
</compile_context>

<pallas_src>
import functools

import jax
import jax.numpy as jnp
from jax import lax
from jax.experimental import pallas as pl
from jax.experimental.pallas import tpu as pltpu


def _round_up(x, m):
    return ((x + m - 1) // m) * m


def _abs_pow(diff, p):
    """torch.abs((a - b) ** p) for static p (the redundant abs is skipped).

    Non-integer p keeps the reference semantics (diff ** p before abs), i.e.
    NaN for negative diffs, exactly like torch.abs((a - b) ** p).
    """
    p = float(p)
    if p == 1.0:
        return jnp.abs(diff)
    if p == 2.0:
        return diff * diff                        # already non-negative
    if p.is_integer():
        out = diff
        for _ in range(int(p) - 1):
            out = out * diff
        return jnp.abs(out)
    return jnp.abs(diff ** p)


def rtd_pairs_kernel(dr1_ref, dr2_ref,
                     brow_ref, bcol_ref, bbot_ref,
                     drow_ref, dcol_ref, dbot_ref,
                     out_ref, *, p):
    """One (direction, dim) grid cell: sum_i |DX_2[death_i] - DX[birth_i]|^p."""
    n_sub, n_lane = dr1_ref.shape
    card_pad = brow_ref.shape[0]

    row_iota = lax.broadcasted_iota(jnp.int32, (card_pad, n_sub), 1)
    lane_iota = lax.broadcasted_iota(jnp.int32, (card_pad, n_lane), 1)

    # One-hot row masks (MXU gather).  Out-of-range rows -> all-zero row.
    oh_b = (row_iota == brow_ref[...]).astype(jnp.float32)        # (card_pad, n_sub)
    oh_d = (row_iota == drow_ref[...]).astype(jnp.float32)

    dr1 = dr1_ref[...]
    dr2 = dr2_ref[...]

    # Birth rows from DX: Dr1 in the off-diagonal blocks, min(Dr1, Dr2)
    # (direction invariant) in the bottom-right block.
    g1_b = jnp.dot(oh_b, dr1, preferred_element_type=jnp.float32)
    g2_b = jnp.dot(oh_b, dr2, preferred_element_type=jnp.float32)
    b_bot = jnp.broadcast_to(bbot_ref[...], (card_pad, n_lane)) != 0
    birth_rows = jnp.where(b_bot, jnp.minimum(g1_b, g2_b), g1_b)

    # Death rows from DX_2: Dr1 in the off-diagonal blocks; the bottom-right
    # block is z for both directions -- host pre-zeroes dbot for the zx
    # direction (where z == Dr1), so "flag set" always means "use dr2".
    g1_d = jnp.dot(oh_d, dr1, preferred_element_type=jnp.float32)
    g2_d = jnp.dot(oh_d, dr2, preferred_element_type=jnp.float32)
    d_bot = jnp.broadcast_to(dbot_ref[...], (card_pad, n_lane)) != 0
    death_rows = jnp.where(d_bot, g2_d, g1_d)

    # Column pick via lane-iota one-hot, fused into a single cross-lane reduce
    # yielding death_i - birth_i.  col == n_lane (sentinel) matches nothing ->
    # exact 0 (top-left block of the joint matrix / padding pairs).
    diff_rows = (jnp.where(lane_iota == dcol_ref[...], death_rows, 0.0)
                 - jnp.where(lane_iota == bcol_ref[...], birth_rows, 0.0))
    diff = jnp.sum(diff_rows, axis=1, keepdims=True)              # (card_pad, 1)
    partial = jnp.sum(_abs_pow(diff, p))
    out_ref[...] = jnp.full(out_ref.shape, partial, jnp.float32)


def _prep_pairs(ids, n, card, card_pad, col_sentinel):
    """(2N,2N) joint-matrix indices -> per-block (row, col, use_bottom) triples.

    col == col_sentinel encodes "value is 0" (top-left block / padding): the
    in-kernel lane one-hot then matches nothing, contributing exactly 0.
    """
    t = ids.astype(jnp.int32).reshape(2 * card, 2)

    def split(rc):
        r, c = rc[:, 0], rc[:, 1]
        r_hi = r >= n
        c_hi = c >= n
        both = r_hi & c_hi                        # bottom-right block
        bl = r_hi & jnp.logical_not(c_hi)         # bottom-left: Dr1[r-n, c]
        tr = jnp.logical_not(r_hi) & c_hi         # top-right:   Dr1[c-n, r]
        row = jnp.where(both | bl, r - n, jnp.where(tr, c - n, 0))
        col = jnp.where(both, c - n,
              jnp.where(bl, c,
              jnp.where(tr, r, col_sentinel)))    # top-left block is exactly 0
        return row.astype(jnp.int32), col.astype(jnp.int32), both.astype(jnp.int32)

    b_row, b_col, b_bot = split(t[0::2])          # births -> DX
    d_row, d_col, d_bot = split(t[1::2])          # deaths -> DX_2
    pad = card_pad - card

    def pad_to(a, fill):
        if pad == 0:
            return a
        return jnp.concatenate([a, jnp.full((pad,), fill, jnp.int32)])

    return (pad_to(b_row, 0), pad_to(b_col, col_sentinel), pad_to(b_bot, 0),
            pad_to(d_row, 0), pad_to(d_col, col_sentinel), pad_to(d_bot, 0))


def _physical_vmem_bytes():
    try:
        return int(pltpu.get_tpu_info().vmem_capacity_bytes)
    except Exception:
        return 64 << 20                            # v7x is the smallest per-TC VMEM


def rtd_loss_forward(x_dist, z_dist, ids_xz, ids_zx=None, *, p=1.0, is_sym=True,
                     mode='minimum'):
    """RTDLoss.forward: returns (loss_xz, loss_zx, loss)."""
    if mode != 'minimum':
        raise NotImplementedError("only mode='minimum' (the default) is implemented")
    n = x_dist.shape[0]
    n_dim = len(ids_xz)
    n_dir = 2 if is_sym else 1
    card = ids_xz[0].shape[0] // 4
    card_pad = _round_up(card, 8)                 # sublane multiple
    n_sub = _round_up(n, 8)
    n_lane = _round_up(n, 128)                    # lane-dense last dim

    x_pad = jnp.zeros((n_sub, n_lane), jnp.float32).at[:n, :n].set(
        x_dist.astype(jnp.float32))
    z_pad = jnp.zeros((n_sub, n_lane), jnp.float32).at[:n, :n].set(
        z_dist.astype(jnp.float32))
    # Stacked so the direction branch lives in the BlockSpec index_map:
    # dr1 view = stk[d], dr2 view = stk[1 - d]; same bytes, no in-kernel selects.
    stk = jnp.stack([x_pad, z_pad])

    all_ids = [ids_xz, ids_zx] if is_sym else [ids_xz]
    meta = {k: [] for k in ("brow", "bcol", "bbot", "drow", "dcol", "dbot")}
    for d in range(n_dir):
        for m in range(n_dim):
            br, bc, bf, dr_, dc, df = _prep_pairs(all_ids[d][m], n, card, card_pad,
                                                  n_lane)
            if d == 1:
                # zx direction (immovable=2): DX_2's bottom block is Dr1 (= z),
                # so the "death row comes from dr2" flag is never set.
                df = jnp.zeros_like(df)
            meta["brow"].append(br); meta["bcol"].append(bc); meta["bbot"].append(bf)
            meta["drow"].append(dr_); meta["dcol"].append(dc); meta["dbot"].append(df)

    def cell_i32(xs):                             # (n_dir, n_dim, card_pad, 1) int32
        return jnp.stack(xs).reshape(n_dir, n_dim, card_pad, 1)

    mat_spec_1 = pl.BlockSpec((None, n_sub, n_lane), lambda d, m: (d, 0, 0))
    mat_spec_2 = pl.BlockSpec((None, n_sub, n_lane), lambda d, m: (1 - d, 0, 0))
    meta_spec = pl.BlockSpec((None, None, card_pad, 1), lambda d, m: (d, m, 0, 0))
    out_spec = pl.BlockSpec((None, None, 1, 128), lambda d, m: (d, m, 0, 0))

    # Rough VMEM budget: both full-matrix views (double-buffered by the grid
    # pipeline), metadata / output blocks, and the gather temporaries.  Raise
    # the scoped limit only when the smallest default (16 MiB on v5e) would not
    # fit, capped generation-aware (v7x: 64 MiB physical per TensorCore).
    mat_bytes = n_sub * n_lane * 4
    approx_vmem = (2 * 2 * mat_bytes                   # dr1 / dr2 views, 2 buffers
                   + 6 * 2 * card_pad * 128 * 4        # metadata blocks (lane padded)
                   + 2 * 128 * 4                       # output blocks
                   + 8 * card_pad * n_lane * 4         # one-hot / gathered temporaries
                   + (1 << 20))
    cp_kwargs = dict(dimension_semantics=("parallel", "parallel"))
    if approx_vmem > (16 << 20):
        cp_kwargs["vmem_limit_bytes"] = int(min(approx_vmem,
                                                _physical_vmem_bytes() - (8 << 20)))
    # TODO(synk): for very large N (2*N^2*4B past the cap above) add a lane-tile
    # grid axis ("arbitrary") with per-tile column offsets and an accumulated
    # output instead of keeping x/z fully resident; and for N >~ 2k switch the
    # O(card*N^2) MXU one-hot gather back to an unrolled per-pair row gather.

    out = pl.pallas_call(
        functools.partial(rtd_pairs_kernel, p=p),
        out_shape=jax.ShapeDtypeStruct((n_dir, n_dim, 1, 128), jnp.float32),
        grid_spec=pltpu.PrefetchScalarGridSpec(
            num_scalar_prefetch=0,
            grid=(n_dir, n_dim),
            in_specs=[mat_spec_1, mat_spec_2,
                      meta_spec, meta_spec, meta_spec,
                      meta_spec, meta_spec, meta_spec],
            out_specs=out_spec,
        ),
        compiler_params=pltpu.CompilerParams(**cp_kwargs),
    )(stk, stk,
      cell_i32(meta["brow"]), cell_i32(meta["bcol"]), cell_i32(meta["bbot"]),
      cell_i32(meta["drow"]), cell_i32(meta["dcol"]), cell_i32(meta["dbot"]))

    partials = out[:, :, 0, 0]                    # (n_dir, n_dim)
    loss_xz = jnp.sum(partials[0])
    loss_zx = jnp.sum(partials[1]) if is_sym else jnp.float32(0.0)
    loss = (loss_xz + loss_zx) / 2.0
    return loss_xz, loss_zx, loss


if __name__ == "__main__":
    N, D, DIM, CARD = 16, 8, 1, 50
    key = jax.random.PRNGKey(0)
    k1, k2, k3, k4 = jax.random.split(key, 4)

    def pdist(pts):
        d2 = jnp.sum((pts[:, None, :] - pts[None, :, :]) ** 2, axis=-1)
        return jnp.sqrt(jnp.maximum(d2, 0.0))

    x_dist = pdist(jax.random.normal(k1, (N, D), jnp.float32))
    z_dist = pdist(jax.random.normal(k2, (N, D), jnp.float32))

    # TODO(synk): the Vietoris-Rips persistence pairing (`Rips`/ripser/giotto) is
    # a CPU combinatorial algorithm with no Pallas equivalent; persistence-pair
    # indices are synthesized deterministically here as a stand-in.
    ids_xz = [jax.random.randint(k3, (4 * CARD,), 0, 2 * N, dtype=jnp.int32)
              for _ in range(DIM)]
    ids_zx = [jax.random.randint(k4, (4 * CARD,), 0, 2 * N, dtype=jnp.int32)
              for _ in range(DIM)]

    loss_xz, loss_zx, loss = jax.block_until_ready(
        rtd_loss_forward(x_dist, z_dist, ids_xz, ids_zx, p=1.0, is_sym=True))

    # Pure-JAX reference of the differentiable part (same indices, same formula).
    def ref_direction(dr1, dr2, dfix, ids, p):
        n = dr1.shape[0]
        z = jnp.zeros((n, n), jnp.float32)
        dx = jnp.block([[z, dr1.T], [dr1, jnp.minimum(dr1, dr2)]])
        dx2 = jnp.block([[z, dr1.T], [dr1, dfix]])
        t = ids.reshape(-1, 2)
        birth = dx[t[0::2, 0], t[0::2, 1]]
        death = dx2[t[1::2, 0], t[1::2, 1]]
        return jnp.sum(jnp.abs((death - birth) ** p))

    ref_xz = sum(ref_direction(x_dist, z_dist, z_dist, i, 1.0) for i in ids_xz)
    ref_zx = sum(ref_direction(z_dist, x_dist, z_dist, i, 1.0) for i in ids_zx)
    assert jnp.allclose(loss_xz, ref_xz, rtol=1e-4, atol=1e-4), (loss_xz, ref_xz)
    assert jnp.allclose(loss_zx, ref_zx, rtol=1e-4, atol=1e-4), (loss_zx, ref_zx)
    assert jnp.allclose(loss, (ref_xz + ref_zx) / 2.0, rtol=1e-4, atol=1e-4)

    print("KERNEL_OK")
</pallas_src>

<mosaic_0001>
module attributes {stable_mosaic.version = 11 : i64} {
  func.func @rtd_pairs_kernel(%arg0: i32, %arg1: i32, %arg2: memref<1x16x128xf32, #tpu.memory_space<vmem>>, %arg3: memref<1x16x128xf32, #tpu.memory_space<vmem>>, %arg4: memref<1x1x56x1xi32, #tpu.memory_space<vmem>>, %arg5: memref<1x1x56x1xi32, #tpu.memory_space<vmem>>, %arg6: memref<1x1x56x1xi32, #tpu.memory_space<vmem>>, %arg7: memref<1x1x56x1xi32, #tpu.memory_space<vmem>>, %arg8: memref<1x1x56x1xi32, #tpu.memory_space<vmem>>, %arg9: memref<1x1x56x1xi32, #tpu.memory_space<vmem>>, %arg10: memref<1x1x1x128xf32, #tpu.memory_space<vmem>>) attributes {dimension_semantics = [#tpu.dimension_semantics<parallel>, #tpu.dimension_semantics<parallel>], iteration_bounds = array<i64: 2, 1>, scalar_prefetch = 0 : i64, scratch_operands = 0 : i64, tpu.core_type = #tpu.core_type<tc>, window_params = [{transform_indices = @transform_0, window_bounds = array<i64: 1, 16, 128>}, {transform_indices = @transform_1, window_bounds = array<i64: 1, 16, 128>}, {transform_indices = @transform_2, window_bounds = array<i64: 1, 1, 56, 1>}, {transform_indices = @transform_3, window_bounds = array<i64: 1, 1, 56, 1>}, {transform_indices = @transform_4, window_bounds = array<i64: 1, 1, 56, 1>}, {transform_indices = @transform_5, window_bounds = array<i64: 1, 1, 56, 1>}, {transform_indices = @transform_6, window_bounds = array<i64: 1, 1, 56, 1>}, {transform_indices = @transform_7, window_bounds = array<i64: 1, 1, 56, 1>}, {transform_indices = @transform_8, window_bounds = array<i64: 1, 1, 1, 128>}]} {
    %0 = tpu.iota {dimensions = array<i32: 1>} : vector<56x16xi32>
    %1 = tpu.iota {dimensions = array<i32: 1>} : vector<56x128xi32>
    %c0 = arith.constant 0 : index
    %c0_0 = arith.constant 0 : index
    %c0_1 = arith.constant 0 : index
    %c0_2 = arith.constant 0 : index
    %2 = vector.load %arg4[%c0, %c0_0, %c0_1, %c0_2] : memref<1x1x56x1xi32, #tpu.memory_space<vmem>>, vector<1x1x56x1xi32>
    %3 = vector.shape_cast %2 : vector<1x1x56x1xi32> to vector<56x1xi32>
    %4 = vector.broadcast %3 : vector<56x1xi32> to vector<56x16xi32>
    %5 = arith.cmpi eq, %0, %4 : vector<56x16xi32>
    %6 = arith.extui %5 : vector<56x16xi1> to vector<56x16xi32>
    %7 = arith.sitofp %6 : vector<56x16xi32> to vector<56x16xf32>
    %c0_3 = arith.constant 0 : index
    %c0_4 = arith.constant 0 : index
    %c0_5 = arith.constant 0 : index
    %c0_6 = arith.constant 0 : index
    %8 = vector.load %arg7[%c0_3, %c0_4, %c0_5, %c0_6] : memref<1x1x56x1xi32, #tpu.memory_space<vmem>>, vector<1x1x56x1xi32>
    %9 = vector.shape_cast %8 : vector<1x1x56x1xi32> to vector<56x1xi32>
    %10 = vector.broadcast %9 : vector<56x1xi32> to vector<56x16xi32>
    %11 = arith.cmpi eq, %0, %10 : vector<56x16xi32>
    %12 = arith.extui %11 : vector<56x16xi1> to vector<56x16xi32>
    %13 = arith.sitofp %12 : vector<56x16xi32> to vector<56x16xf32>
    %c0_7 = arith.constant 0 : index
    %c0_8 = arith.constant 0 : index
    %c0_9 = arith.constant 0 : index
    %14 = vector.load %arg2[%c0_7, %c0_8, %c0_9] : memref<1x16x128xf32, #tpu.memory_space<vmem>>, vector<1x16x128xf32>
    %15 = vector.shape_cast %14 : vector<1x16x128xf32> to vector<16x128xf32>
    %c0_10 = arith.constant 0 : index
    %c0_11 = arith.constant 0 : index
    %c0_12 = arith.constant 0 : index
    %16 = vector.load %arg3[%c0_10, %c0_11, %c0_12] : memref<1x16x128xf32, #tpu.memory_space<vmem>>, vector<1x16x128xf32>
    %17 = vector.shape_cast %16 : vector<1x16x128xf32> to vector<16x128xf32>
    %cst = arith.constant dense<0.000000e+00> : vector<56x128xf32>
    %18 = tpu.matmul %7, %15, %cst {dimension_numbers = #tpu.dot_dimension_numbers<[1], [0], [0], [1], [0, 0, 1, 1], [], []>} : vector<56x16xf32>, vector<16x128xf32>, vector<56x128xf32> -> vector<56x128xf32>
    %cst_13 = arith.constant dense<0.000000e+00> : vector<56x128xf32>
    %19 = tpu.matmul %7, %17, %cst_13 {dimension_numbers = #tpu.dot_dimension_numbers<[1], [0], [0], [1], [0, 0, 1, 1], [], []>} : vector<56x16xf32>, vector<16x128xf32>, vector<56x128xf32> -> vector<56x128xf32>
    %c0_14 = arith.constant 0 : index
    %c0_15 = arith.constant 0 : index
    %c0_16 = arith.constant 0 : index
    %c0_17 = arith.constant 0 : index
    %20 = vector.load %arg6[%c0_14, %c0_15, %c0_16, %c0_17] : memref<1x1x56x1xi32, #tpu.memory_space<vmem>>, vector<1x1x56x1xi32>
    %21 = vector.shape_cast %20 : vector<1x1x56x1xi32> to vector<56x1xi32>
    %22 = vector.shape_cast %21 : vector<56x1xi32> to vector<56x1xi32>
    %23 = vector.broadcast %22 : vector<56x1xi32> to vector<56x128xi32>
    %c0_i32 = arith.constant 0 : i32
    %24 = vector.broadcast %c0_i32 : i32 to vector<56x128xi32>
    %25 = arith.cmpi ne, %23, %24 : vector<56x128xi32>
    %26 = arith.minimumf %18, %19 : vector<56x128xf32>
    %27 = arith.select %25, %26, %18 : vector<56x128xi1>, vector<56x128xf32>
    %cst_18 = arith.constant dense<0.000000e+00> : vector<56x128xf32>
    %28 = tpu.matmul %13, %15, %cst_18 {dimension_numbers = #tpu.dot_dimension_numbers<[1], [0], [0], [1], [0, 0, 1, 1], [], []>} : vector<56x16xf32>, vector<16x128xf32>, vector<56x128xf32> -> vector<56x128xf32>
    %cst_19 = arith.constant dense<0.000000e+00> : vector<56x128xf32>
    %29 = tpu.matmul %13, %17, %cst_19 {dimension_numbers = #tpu.dot_dimension_numbers<[1], [0], [0], [1], [0, 0, 1, 1], [], []>} : vector<56x16xf32>, vector<16x128xf32>, vector<56x128xf32> -> vector<56x128xf32>
    %c0_20 = arith.constant 0 : index
    %c0_21 = arith.constant 0 : index
    %c0_22 = arith.constant 0 : index
    %c0_23 = arith.constant 0 : index
    %30 = vector.load %arg9[%c0_20, %c0_21, %c0_22, %c0_23] : memref<1x1x56x1xi32, #tpu.memory_space<vmem>>, vector<1x1x56x1xi32>
    %31 = vector.shape_cast %30 : vector<1x1x56x1xi32> to vector<56x1xi32>
    %32 = vector.shape_cast %31 : vector<56x1xi32> to vector<56x1xi32>
    %33 = vector.broadcast %32 : vector<56x1xi32> to vector<56x128xi32>
    %c0_i32_24 = arith.constant 0 : i32
    %34 = vector.broadcast %c0_i32_24 : i32 to vector<56x128xi32>
    %35 = arith.cmpi ne, %33, %34 : vector<56x128xi32>
    %36 = arith.select %35, %29, %28 : vector<56x128xi1>, vector<56x128xf32>
    %c0_25 = arith.constant 0 : index
    %c0_26 = arith.constant 0 : index
    %c0_27 = arith.constant 0 : index
    %c0_28 = arith.constant 0 : index
    %37 = vector.load %arg8[%c0_25, %c0_26, %c0_27, %c0_28] : memref<1x1x56x1xi32, #tpu.memory_space<vmem>>, vector<1x1x56x1xi32>
    %38 = vector.shape_cast %37 : vector<1x1x56x1xi32> to vector<56x1xi32>
    %39 = vector.broadcast %38 : vector<56x1xi32> to vector<56x128xi32>
    %40 = arith.cmpi eq, %1, %39 : vector<56x128xi32>
    %cst_29 = arith.constant 0.000000e+00 : f32
    %41 = vector.broadcast %cst_29 : f32 to vector<56x128xf32>
    %42 = arith.select %40, %36, %41 : vector<56x128xi1>, vector<56x128xf32>
    %c0_30 = arith.constant 0 : index
    %c0_31 = arith.constant 0 : index
    %c0_32 = arith.constant 0 : index
    %c0_33 = arith.constant 0 : index
    %43 = vector.load %arg5[%c0_30, %c0_31, %c0_32, %c0_33] : memref<1x1x56x1xi32, #tpu.memory_space<vmem>>, vector<1x1x56x1xi32>
    %44 = vector.shape_cast %43 : vector<1x1x56x1xi32> to vector<56x1xi32>
    %45 = vector.broadcast %44 : vector<56x1xi32> to vector<56x128xi32>
    %46 = arith.cmpi eq, %1, %45 : vector<56x128xi32>
    %cst_34 = arith.constant 0.000000e+00 : f32
    %47 = vector.broadcast %cst_34 : f32 to vector<56x128xf32>
    %48 = arith.select %46, %27, %47 : vector<56x128xi1>, vector<56x128xf32>
    %49 = arith.subf %42, %48 : vector<56x128xf32>
    %cst_35 = arith.constant dense<0.000000e+00> : vector<56xf32>
    %50 = vector.multi_reduction <add>, %49, %cst_35 [1] : vector<56x128xf32> to vector<56xf32>
    %51 = vector.shape_cast %50 : vector<56xf32> to vector<56x1xf32>
    %52 = math.absf %51 : vector<56x1xf32>
    %53 = vector.shape_cast %52 : vector<56x1xf32> to vector<1x56x1xf32>
    %cst_36 = arith.constant dense<0.000000e+00> : vector<1xf32>
    %54 = vector.multi_reduction <add>, %53, %cst_36 [1, 2] : vector<1x56x1xf32> to vector<1xf32>
    %55 = vector.shape_cast %54 : vector<1xf32> to vector<1x1x1xf32>
    %56 = vector.extract %55[0, 0, 0] : f32 from vector<1x1x1xf32>
    %57 = vector.broadcast %56 : f32 to vector<1x128xf32>
    %c0_37 = arith.constant 0 : index
    %c0_38 = arith.constant 0 : index
    %c0_39 = arith.constant 0 : index
    %c0_40 = arith.constant 0 : index
    %58 = vector.load %arg10[%c0_37, %c0_38, %c0_39, %c0_40] : memref<1x1x1x128xf32, #tpu.memory_space<vmem>>, vector<1x1x1x128xf32>
    %59 = vector.shape_cast %58 : vector<1x1x1x128xf32> to vector<1x128xf32>
    %60 = vector.shape_cast %57 : vector<1x128xf32> to vector<1x1x1x128xf32>
    tpu.vector_store %arg10[%c0_37, %c0_38, %c0_39, %c0_40], %60 {strides = array<i32>} : memref<1x1x1x128xf32, #tpu.memory_space<vmem>>, vector<1x1x1x128xf32>,
    return
  }
  func.func @transform_0(%arg0: i32, %arg1: i32) -> (i32, i32, i32) {
    %c0_i32 = arith.constant 0 : i32
    %c0_i32_0 = arith.constant 0 : i32
    %c0_i32_1 = arith.constant 0 : i32
    return %arg0, %c0_i32, %c0_i32_0 : i32, i32, i32
  }
  func.func @transform_1(%arg0: i32, %arg1: i32) -> (i32, i32, i32) {
    %c1_i32 = arith.constant 1 : i32
    %0 = arith.subi %c1_i32, %arg0 : i32
    %c0_i32 = arith.constant 0 : i32
    %c0_i32_0 = arith.constant 0 : i32
    %c0_i32_1 = arith.constant 0 : i32
    return %0, %c0_i32, %c0_i32_0 : i32, i32, i32
  }
  func.func @transform_2(%arg0: i32, %arg1: i32) -> (i32, i32, i32, i32) {
    %c0_i32 = arith.constant 0 : i32
    %c0_i32_0 = arith.constant 0 : i32
    %c0_i32_1 = arith.constant 0 : i32
    return %arg0, %arg1, %c0_i32, %c0_i32_0 : i32, i32, i32, i32
  }
  func.func @transform_3(%arg0: i32, %arg1: i32) -> (i32, i32, i32, i32) {
    %c0_i32 = arith.constant 0 : i32
    %c0_i32_0 = arith.constant 0 : i32
    %c0_i32_1 = arith.constant 0 : i32
    return %arg0, %arg1, %c0_i32, %c0_i32_0 : i32, i32, i32, i32
  }
  func.func @transform_4(%arg0: i32, %arg1: i32) -> (i32, i32, i32, i32) {
    %c0_i32 = arith.constant 0 : i32
    %c0_i32_0 = arith.constant 0 : i32
    %c0_i32_1 = arith.constant 0 : i32
    return %arg0, %arg1, %c0_i32, %c0_i32_0 : i32, i32, i32, i32
  }
  func.func @transform_5(%arg0: i32, %arg1: i32) -> (i32, i32, i32, i32) {
    %c0_i32 = arith.constant 0 : i32
    %c0_i32_0 = arith.constant 0 : i32
    %c0_i32_1 = arith.constant 0 : i32
    return %arg0, %arg1, %c0_i32, %c0_i32_0 : i32, i32, i32, i32
  }
  func.func @transform_6(%arg0: i32, %arg1: i32) -> (i32, i32, i32, i32) {
    %c0_i32 = arith.constant 0 : i32
    %c0_i32_0 = arith.constant 0 : i32
    %c0_i32_1 = arith.constant 0 : i32
    return %arg0, %arg1, %c0_i32, %c0_i32_0 : i32, i32, i32, i32
  }
  func.func @transform_7(%arg0: i32, %arg1: i32) -> (i32, i32, i32, i32) {
    %c0_i32 = arith.constant 0 : i32
    %c0_i32_0 = arith.constant 0 : i32
    %c0_i32_1 = arith.constant 0 : i32
    return %arg0, %arg1, %c0_i32, %c0_i32_0 : i32, i32, i32, i32
  }
  func.func @transform_8(%arg0: i32, %arg1: i32) -> (i32, i32, i32, i32) {
    %c0_i32 = arith.constant 0 : i32
    %c0_i32_0 = arith.constant 0 : i32
    %c0_i32_1 = arith.constant 0 : i32
    return %arg0, %arg1, %c0_i32, %c0_i32_0 : i32, i32, i32, i32
  }
}

</mosaic_0001>

<bundles_post_ra>
// kernel: tpu_custom_call.1
= control target key start
LH: loop header
LB: loop body
LE: loop exit
PB: predicated region body
PF: predicated region fallthrough
CT: control target
= control target key end

     0   :  { %s2339_s0 = inlined_call_operand.vmem [shape: f32[2,16,128], index: 0, kind: input, shape index: {}]   ;;  %s2340_s1 = inlined_call_operand.vmem [shape: f32[2,16,128], index: 1, kind: input, shape index: {}]   ;;  %s2341_s2 = inlined_call_operand.vmem [shape: s32[2,1,56,1], index: 2, kind: input, shape index: {}]   ;;  %s2342_s3 = inlined_call_operand.vmem [shape: s32[2,1,56,1], index: 3, kind: input, shape index: {}]   ;;  %s2343_s4 = inlined_call_operand.vmem [shape: s32[2,1,56,1], index: 4, kind: input, shape index: {}]   ;;  %s2344_s5 = inlined_call_operand.vmem [shape: s32[2,1,56,1], index: 5, kind: input, shape index: {}]   ;;  %s2345_s6 = inlined_call_operand.vmem [shape: s32[2,1,56,1], index: 6, kind: input, shape index: {}]   ;;  %s2346_s7 = inlined_call_operand.vmem [shape: s32[2,1,56,1], index: 7, kind: input, shape index: {}]   ;;  %s2347_s8 = inlined_call_operand.hbm [shape: f32[2,1,1,128], index: 8, kind: output, shape index: {}]  }
   0x1   :  { %2348 = sst [smem:[#allocation5_spill]] %s2339_s0 }
   0x2   :  { %13 = vsyncpa [#allocation3], 0 }
   0x3   :  { %15 = vsyncpa [#allocation3 + $0x1], 0  ;;  %s1927_s27 = smov 0   ;;  %s1929_s28 = smov 0  }
   0x4   :  { %s1931_s29 = smov 0   ;;  %s1933_s30 = smov 0  }
   0x5   :  { %s1935_s9 = smov 0   ;;  %s1937_s10 = smov 0  }
   0x6 LB: > { %s1539_s11 = sadd.s32 4294967295, %s1876_s10   ;;  %s1540_s12 = sadd.s32 4294967294, %s1876_s10   ;;  %s1876_s10 = sphi %s1937_s10, %s21_s10   ;;  %s1872_s9 = sphi %s1935_s9, %s2356_s9   ;;  %s1868_s30 = sphi %s1933_s30, %s2355_s30   ;;  %s1864_s29 = sphi %s1931_s29, %s2354_s29   ;;  %s1860_s28 = sphi %s1929_s28, %s2353_s28   ;;  %s1856_s27 = sphi %s1927_s27, %s2352_s27  }
   0x7   : > { %s33_s13 = sadd.s32 1, %s1872_s9  ;;  %s264_s14 = sadd.s32 1, %s1864_s29 }
   0x8   : > { %p35_p0 = scmp.ge.s32.totalorder %s33_s13, 2  ;;  %p274_p1 = scmp.ne.s32.totalorder %s1864_s29, %s1860_s28 }
   0x9   : > { %p275_p2 = scmp.eq.s32.totalorder %s1539_s11, 1  ;;  %p280_p3 = scmp.ne.s32.totalorder %s1860_s28, %s1856_s27 }
   0xa   : > { %s2358_s13 = smov (%p35_p0, %s33_s13), 0  ;;  %p281_p5 = scmp.eq.s32.totalorder %s1540_s12, 1 }
   0xb   : > { %p1967_p4 = por %p275_p2, %p274_p1  ;;  %s259_s16 = ssub.s32 %s1872_s9, %s2358_s13 }
   0xc   : > { %p1543_p6 = scmp.ge.s32.totalorder %s1876_s10, 1  ;;  %p262_p7 = scmp.eq.s32.totalorder %s259_s16, 0 }
   0xd   : > { %p1974_p8 = por %p281_p5, %p280_p3  ;;  %p389_p9 = scmp.lt.s32.totalorder %s1876_s10, 3 }
   0xe   : > { %s1980_s18 = scalar_select %p262_p7, %s1864_s29, %s264_s14  }
   0xf   : > { %p390_p10 = pnand %p1543_p6, %p389_p9 }
  0x10   : > { %p482_p11 = scmp.lt.s32.totalorder (!%p390_p10), %s1868_s30, 1  ;;  %s487_s20 = ssub.s32 (!%p390_p10), 1, %s1868_s30 }
  0x11   : > { %393 = sbr.rel (%p390_p10) target bundleno = 760 (0x2f8), region = 52  ;;  %s2351_s0 = sld [smem:[#allocation5_spill]] (!%p390_p10) }
  0x12   : > { %p488_p12 = scmp.lt.s32.totalorder (!%p390_p10), %s487_s20, 1 }
  0x16   : > { %v1878_v0 = vmov 0   ;;  %s483_s19 = scalar_select %p482_p11, %s1868_s30, 1  ;;  %v1879_v1 = vmov 0.0   ;;  %vm1880_vm0 = vmmov 0   ;;  %v548_v48 = vlaneseq }
  0x17   : > { %1799 = vset.pattern.permute.xlu1 %v1878_v0  ;;  %1798 = vset.pattern.permute.xlu0 %v1878_v0  ;;  %s2360_s20 = smov (!%p488_p12, %s487_s20), 1  ;;  %vm652_vm1 = vcmask 130048  }
  0x18   : > { %1637 = vmatprep.subr.mxu0 %v1879_v1  ;;  %1662 = vmatprep.subr.mxu1 %v1879_v1  ;;  %s1987_s21 = smul.u32 56, %s483_s19  ;;  %s1599_s22 = sshll.u32 %s483_s19, 4  ;;  %v2075_v49 = vand.u32 127, %v548_v48 }
  0x19   : > { %s486_s25 = scalar_lea.vmem %s2351_s0, %s1599_s22  ;;  %1641 = vmatprep.mubr.msk.f32.mxu0 %vm1880_vm0, %v1879_v1  ;;  %1666 = vmatprep.mubr.msk.f32.mxu1 %vm1880_vm0, %v1879_v1  ;;  %s1600_s22 = sshll.u32 %s2360_s20, 4 }
  0x1a   : > { %s502_s12 = scalar_lea.vmem %s2341_s2, %s1987_s21  ;;  %v2000_v2 = vld [vmem:[%s486_s25 + $0x8] sm:$0xff]  ;;  %v2003_v5 = vld [vmem:[%s486_s25] sm:$0xff]  ;;  %s529_s19 = scalar_lea.vmem %s2344_s5, %s1987_s21 }
  0x1b   : > { %v552_v3 = vld [vmem:[%s502_s12 + $0x10] sm:$0xff]  ;;  %v550_v4 = vld [vmem:[%s502_s12] sm:$0xff]  ;;  %1638 = vmatpush3.msra.mxu0 %v2000_v2  ;;  %v553_v6 = vld [vmem:[%s502_s12 + $0x18] sm:$0xff]  ;;  %s492_s25 = scalar_lea.vmem %s2340_s1, %s1600_s22  ;;  %s2027_s11 = scalar_lea.vmem %s2343_s4, %s1987_s21 }
  0x1c   : > { %564 = vperm.xlu1 %1799, %v552_v3   ;;  %558 = vperm.xlu0 %1798, %v550_v4   ;;  %v551_v7 = vld [vmem:[%s502_s12 + $0x8] sm:$0xff]  ;;  %v554_v9 = vld [vmem:[%s502_s12 + $0x20] sm:$0xff]  ;;  %v556_v11 = vld [vmem:[%s502_s12 + $0x30] sm:$0xff]  ;;  %s2035_s16 = scalar_lea.vmem %s2346_s7, %s1987_s21  ;;  %s2043_s23 = scalar_lea.vmem %s2345_s6, %s1987_s21 }
  0x1d   : > { %1639 = vmatprep.subr.mxu0 %v1879_v1  ;;  %v555_v8 = vld [vmem:[%s502_s12 + $0x28] sm:$0xff]  ;;  %v599_v10 = vld [vmem:[%s529_s19] sm:$0xff]  ;;  %v601_v12 = vld [vmem:[%s529_s19 + $0x10] sm:$0xff]  ;;  %s2051_s20 = scalar_lea.vmem %s2342_s3, %s1987_s21  ;;  %s480_s21 = sand.u32 1, %s1860_s28  }
  0x1e   : > { %1640 = vmatpush3.msra.mxu0 %v2003_v5  ;;  %v600_v13 = vld [vmem:[%s529_s19 + $0x8] sm:$0xff]  ;;  %v2018_v15 = vld [vmem:[%s492_s25] sm:$0xff]  ;;  %v602_v17 = vld [vmem:[%s529_s19 + $0x18] sm:$0xff]  ;;  %s481_s26 = scalar_lea.vmem [#allocation2], %s480_s21  ;;  %s1596_s12 = sshll.u32 %s1868_s30, 4 }
  0x1f   : > { %1687 = vmatprep.subr.mxu0 %v1879_v1  ;;  %v2015_v14 = vld [vmem:[%s492_s25 + $0x8] sm:$0xff]  ;;  %v603_v16 = vld [vmem:[%s529_s19 + $0x20] sm:$0xff]  ;;  %v605_v18 = vld [vmem:[%s529_s19 + $0x30] sm:$0xff]  ;;  %s1335_s22 = scalar_lea.hbm %s2347_s8, %s1596_s12  ;;  %s1881_s25 = smov [#allocation2]  }
  0x20   : > { %567 = vperm.xlu1 %1799, %v553_v6   ;;  %561 = vperm.xlu0 %1798, %v551_v7   ;;  %v604_v19 = vld [vmem:[%s529_s19 + $0x28] sm:$0xff]  ;;  %v874_v21 = vld [vmem:[%s2027_s11] sm:$0xff]  ;;  %v1146_v28 = vld [vmem:[%s2035_s16 + $0x10] sm:$0xff]  ;;  %s1804_s30 = sshll.u32 %s1881_s25, 4  ;;  %s1805_s30 = int_to_ptr.vmem [resolvable:$false] %s1804_s30 }
  0x21   : > { %1663 = vmatpush3.msra.mxu1 %v2015_v14  ;;  %v875_v20 = vld [vmem:[%s2027_s11 + $0x8] sm:$0xff]  ;;  %v1144_v23 = vld [vmem:[%s2035_s16] sm:$0xff]  ;;  %v876_v29 = vld [vmem:[%s2027_s11 + $0x10] sm:$0xff] }
  0x22   : > { %1664 = vmatprep.subr.mxu1 %v1879_v1  ;;  %v1145_v22 = vld [vmem:[%s2035_s16 + $0x8] sm:$0xff]  ;;  %v1186_v25 = vld [vmem:[%s2043_s23] sm:$0xff]  ;;  %v1230_v30 = vld [vmem:[%s2051_s20 + $0x10] sm:$0xff] }
  0x23   : > { %1665 = vmatpush3.msra.mxu1 %v2018_v15  ;;  %v1187_v24 = vld [vmem:[%s2043_s23 + $0x8] sm:$0xff]  ;;  %v1228_v27 = vld [vmem:[%s2051_s20] sm:$0xff]  ;;  %v1188_v31 = vld [vmem:[%s2043_s23 + $0x10] sm:$0xff] }
  0x24   : > { %573 = vperm.xlu1 %1799, %v555_v8   ;;  %570 = vperm.xlu0 %1798, %v554_v9   ;;  %v1229_v26 = vld [vmem:[%s2051_s20 + $0x8] sm:$0xff]  ;;  %v1147_v32 = vld [vmem:[%s2035_s16 + $0x18] sm:$0xff]  ;;  %v1148_v36 = vld [vmem:[%s2035_s16 + $0x20] sm:$0xff] }
  0x25   : > { %1712 = vmatprep.subr.mxu1 %v1879_v1  ;;  %v877_v33 = vld [vmem:[%s2027_s11 + $0x18] sm:$0xff]  ;;  %v878_v37 = vld [vmem:[%s2027_s11 + $0x20] sm:$0xff]  ;;  %v1149_v40 = vld [vmem:[%s2035_s16 + $0x28] sm:$0xff] }
  0x26   : > { %v1231_v34 = vld [vmem:[%s2051_s20 + $0x18] sm:$0xff]  ;;  %v1232_v38 = vld [vmem:[%s2051_s20 + $0x20] sm:$0xff]  ;;  %v879_v41 = vld [vmem:[%s2027_s11 + $0x28] sm:$0xff] }
  0x27   : > { %v1189_v35 = vld [vmem:[%s2043_s23 + $0x18] sm:$0xff]  ;;  %v1190_v39 = vld [vmem:[%s2043_s23 + $0x20] sm:$0xff]  ;;  %v1233_v42 = vld [vmem:[%s2051_s20 + $0x28] sm:$0xff] }
  0x28   : > { %607 = vperm.xlu1 %1799, %v599_v10   ;;  %576 = vperm.xlu0 %1798, %v556_v11   ;;  %v1191_v43 = vld [vmem:[%s2043_s23 + $0x28] sm:$0xff]  ;;  %v1150_v44 = vld [vmem:[%s2035_s16 + $0x30] sm:$0xff] }
  0x29   : > { %v880_v45 = vld [vmem:[%s2027_s11 + $0x30] sm:$0xff]  ;;  %s1337_s11 = sshll.u32 %s481_s26, 4  ;;  %s2296_s11 = int_to_ptr.vmem [resolvable:$true] %s1337_s11 }
  0x2a   : > { %v1234_v46 = vld [vmem:[%s2051_s20 + $0x30] sm:$0xff]  ;;  %s1800_s24 = scalar_lea.vmem %s2296_s11, 16  ;;  %s1806_s20 = scalar_lea.vmem %s1805_s30, 32 }
  0x2b   : > { %v1192_v47 = vld [vmem:[%s2043_s23 + $0x30] sm:$0xff]  ;;  %s1324_s23 = scalar_lea.sflag [#allocation3], %s480_s21  ;;  %p1801_p13 = scmp.ne.s32.totalorder %s2296_s11, %s1800_s24 }
  0x2c   : > { %613 = vperm.xlu1 %1799, %v601_v12   ;;  %610 = vperm.xlu0 %1798, %v600_v13   ;;  %p1807_p2 = scmp.lt.s32.totalorder %s2296_s11, %s1805_s30  ;;  %p1808_p3 = scmp.lt.s32.totalorder %s1806_s20, %s1800_s24 }
  0x2d   : > { %p1802_p0 = pnand %p1801_p13, %p1967_p4 }
  0x2e   : > { %p1809_p5 = por %p1808_p3, %p1807_p2 }
  0x2f   : > { %p1803_p1 = pneg %p1802_p0 }
  0x30   : > { %619 = vperm.xlu1 %1799, %v603_v16   ;;  %616 = vperm.xlu0 %1798, %v602_v17  }
  0x31   : > { %p1810_p6 = pnand %p1809_p5, %p1803_p1 }
  0x34   : > { %625 = vperm.xlu1 %1799, %v605_v18   ;;  %622 = vperm.xlu0 %1798, %v604_v19  }
  0x38   : > { %885 = vperm.xlu1 %1799, %v875_v20   ;;  %882 = vperm.xlu0 %1798, %v874_v21  }
  0x3c   : > { %1155 = vperm.xlu1 %1799, %v1145_v22   ;;  %1152 = vperm.xlu0 %1798, %v1144_v23  }
  0x40   : > { %1197 = vperm.xlu1 %1799, %v1187_v24   ;;  %1194 = vperm.xlu0 %1798, %v1186_v25  }
  0x44   : > { %1239 = vperm.xlu1 %1799, %v1229_v26   ;;  %1236 = vperm.xlu0 %1798, %v1228_v27  }
  0x48   : > { %1158 = vperm.xlu1 %1799, %v1146_v28   ;;  %888 = vperm.xlu0 %1798, %v876_v29  }
  0x4c   : > { %1242 = vperm.xlu1 %1799, %v1230_v30   ;;  %1200 = vperm.xlu0 %1798, %v1188_v31  }
  0x50   : > { %1161 = vperm.xlu1 %1799, %v1147_v32   ;;  %891 = vperm.xlu0 %1798, %v877_v33  }
  0x54   : > { %1245 = vperm.xlu1 %1799, %v1231_v34   ;;  %1203 = vperm.xlu0 %1798, %v1189_v35  }
  0x58   : > { %1164 = vperm.xlu1 %1799, %v1148_v36   ;;  %894 = vperm.xlu0 %1798, %v878_v37  }
  0x5c   : > { %1248 = vperm.xlu1 %1799, %v1232_v38   ;;  %1206 = vperm.xlu0 %1798, %v1190_v39  }
  0x60   : > { %1167 = vperm.xlu1 %1799, %v1149_v40   ;;  %897 = vperm.xlu0 %1798, %v879_v41  }
  0x64   : > { %1251 = vperm.xlu1 %1799, %v1233_v42   ;;  %1209 = vperm.xlu0 %1798, %v1191_v43  }
  0x68   : > { %1170 = vperm.xlu1 %1799, %v1150_v44   ;;  %900 = vperm.xlu0 %1798, %v880_v45  }
  0x6c   : > { %1254 = vperm.xlu1 %1799, %v1234_v46   ;;  %1212 = vperm.xlu0 %1798, %v1192_v47  }
  0x97   : > { %v559_v50 = vpop.permute.xlu0 %558  ;;  %v565_v52 = vpop.permute.xlu1 %564 }
  0x98   : > { %vm578_vm2 = vcmp.eq.s32.totalorder %v2075_v49, %v559_v50  ;;  %vm580_vm3 = vcmp.eq.s32.totalorder %v2075_v49, %v565_v52 }
  0x99   : > { %v1554_v51 = vsel %vm578_vm2, 1.0, %v1879_v1  ;;  %v1556_v55 = vsel %vm580_vm3, 1.0, %v1879_v1 }
  0x9a   : > { %1642 = vmatmul.mubr.msk.f32.vlgmr.msra.gmra.mxu0 %vm652_vm1, %v1554_v51  ;;  %1667 = vmatmul.mubr.msk.f32.vlgmr.msra.gmra.mxu1 %vm652_vm1, %v1554_v51 }
  0x9b   : > { %1688 = vmatpush3.msra.mxu0 %v2000_v2  ;;  %1713 = vmatpush3.msra.mxu1 %v2015_v14  ;;  %v562_v53 = vpop.permute.xlu0 %561  ;;  %v568_v56 = vpop.permute.xlu1 %567 }
  0x9c   : > { %vm579_vm4 = vcmp.eq.s32.totalorder %v2075_v49, %v562_v53  ;;  %1644 = vmatprep.mubr.msk.f32.mxu0 %vm1880_vm0, %v1879_v1  ;;  %1669 = vmatprep.mubr.msk.f32.mxu1 %vm1880_vm0, %v1879_v1  ;;  %vm581_vm5 = vcmp.eq.s32.totalorder %v2075_v49, %v568_v56 }
  0x9d   : > { %v1555_v54 = vsel %vm579_vm4, 1.0, %v1879_v1  ;;  %1714 = vmatprep.subr.mxu1 %v1879_v1  ;;  %1689 = vmatprep.subr.mxu0 %v1879_v1  ;;  %v1557_v58 = vsel %vm581_vm5, 1.0, %v1879_v1 }
  0x9e   : > { %1645 = vmatmul.mubr.msk.f32.gmra.mxu0 %vm652_vm1, %v1555_v54  ;;  %1670 = vmatmul.mubr.msk.f32.gmra.mxu1 %vm652_vm1, %v1555_v54 }
  0x9f   : > { %1647 = vmatprep.mubr.msk.f32.mxu0 %vm1880_vm0, %v1879_v1  ;;  %1672 = vmatprep.mubr.msk.f32.mxu1 %vm1880_vm0, %v1879_v1  ;;  %v571_v57 = vpop.permute.xlu0 %570  ;;  %v574_v59 = vpop.permute.xlu1 %573 }
  0xa0   : > { %1690 = vmatpush3.msra.mxu0 %v2003_v5  ;;  %1715 = vmatpush3.msra.mxu1 %v2018_v15  ;;  %vm582_vm6 = vcmp.eq.s32.totalorder %v2075_v49, %v571_v57  ;;  %vm583_vm7 = vcmp.eq.s32.totalorder %v2075_v49, %v574_v59 }
  0xa1   : > { %v1558_v60 = vsel %vm582_vm6, 1.0, %v1879_v1  ;;  %v1559_v62 = vsel %vm583_vm7, 1.0, %v1879_v1 }
  0xa2   : > { %1648 = vmatmul.mubr.msk.f32.gmra.mxu0 %vm652_vm1, %v1556_v55  ;;  %1673 = vmatmul.mubr.msk.f32.gmra.mxu1 %vm652_vm1, %v1556_v55 }
  0xa3   : > { %1650 = vmatprep.mubr.msk.f32.mxu0 %vm1880_vm0, %v1879_v1  ;;  %1675 = vmatprep.mubr.msk.f32.mxu1 %vm1880_vm0, %v1879_v1  ;;  %v577_v61 = vpop.permute.xlu0 %576  ;;  %v608_v63 = vpop.permute.xlu1 %607 }
  0xa4   : > { %vm584_vm8 = vcmp.eq.s32.totalorder %v2075_v49, %v577_v61  ;;  %vm627_vm9 = vcmp.eq.s32.totalorder %v2075_v49, %v608_v63 }
  0xa5   : > { %v1560_v0 = vsel %vm584_vm8, 1.0, %v1879_v1  ;;  %v1561_v3 = vsel %vm627_vm9, 1.0, %v1879_v1 }
  0xa6   : > { %1651 = vmatmul.mubr.msk.f32.gmra.mxu0 %vm652_vm1, %v1557_v58  ;;  %1676 = vmatmul.mubr.msk.f32.gmra.mxu1 %vm652_vm1, %v1557_v58 }
  0xa7   : > { %1653 = vmatprep.mubr.msk.f32.mxu0 %vm1880_vm0, %v1879_v1  ;;  %1678 = vmatprep.mubr.msk.f32.mxu1 %vm1880_vm0, %v1879_v1  ;;  %v611_v2 = vpop.permute.xlu0 %610  ;;  %v614_v4 = vpop.permute.xlu1 %613 }
  0xa8   : > { %vm628_vm10 = vcmp.eq.s32.totalorder %v2075_v49, %v611_v2  ;;  %vm629_vm11 = vcmp.eq.s32.totalorder %v2075_v49, %v614_v4 }
  0xa9   : > { %v1562_v5 = vsel %vm628_vm10, 1.0, %v1879_v1  ;;  %v1563_v7 = vsel %vm629_vm11, 1.0, %v1879_v1 }
  0xaa   : > { %1654 = vmatmul.mubr.msk.f32.gmra.mxu0 %vm652_vm1, %v1558_v60  ;;  %1679 = vmatmul.mubr.msk.f32.gmra.mxu1 %vm652_vm1, %v1558_v60 }
  0xab   : > { %1656 = vmatprep.mubr.msk.f32.mxu0 %vm1880_vm0, %v1879_v1  ;;  %1681 = vmatprep.mubr.msk.f32.mxu1 %vm1880_vm0, %v1879_v1  ;;  %v617_v6 = vpop.permute.xlu0 %616  ;;  %v620_v8 = vpop.permute.xlu1 %619 }
  0xac   : > { %vm630_vm12 = vcmp.eq.s32.totalorder %v2075_v49, %v617_v6  ;;  %vm631_vm13 = vcmp.eq.s32.totalorder %v2075_v49, %v620_v8 }
  0xad   : > { %v1564_v9 = vsel %vm630_vm12, 1.0, %v1879_v1  ;;  %v1565_v11 = vsel %vm631_vm13, 1.0, %v1879_v1 }
  0xae   : > { %1657 = vmatmul.mubr.msk.f32.gmra.mxu0 %vm652_vm1, %v1559_v62  ;;  %1682 = vmatmul.mubr.msk.f32.gmra.mxu1 %vm652_vm1, %v1559_v62 }
  0xaf   : > { %1659 = vmatprep.mubr.msk.f32.mxu0 %vm1880_vm0, %v1879_v1  ;;  %1684 = vmatprep.mubr.msk.f32.mxu1 %vm1880_vm0, %v1879_v1  ;;  %v623_v10 = vpop.permute.xlu0 %622  ;;  %v626_v12 = vpop.permute.xlu1 %625 }
  0xb0   : > { %vm632_vm14 = vcmp.eq.s32.totalorder %v2075_v49, %v623_v10  ;;  %vm633_vm15 = vcmp.eq.s32.totalorder %v2075_v49, %v626_v12 }
  0xb1   : > { %v1566_v13 = vsel %vm632_vm14, 1.0, %v1879_v1  ;;  %v1567_v14 = vsel %vm633_vm15, 1.0, %v1879_v1 }
  0xb2   : > { %1660 = vmatmul.mubr.msk.f32.gmra.mxu0 %vm652_vm1, %v1560_v0  ;;  %1685 = vmatmul.mubr.msk.f32.gmra.mxu1 %vm652_vm1, %v1560_v0 }
  0xb3   : > { %1691 = vmatprep.mubr.msk.f32.mxu0 %vm1880_vm0, %v1879_v1  ;;  %1716 = vmatprep.mubr.msk.f32.mxu1 %vm1880_vm0, %v1879_v1  ;;  %v2191_v15 = vpop.permute.xlu1 %885  ;;  %v883_v16 = vpop.permute.xlu0 %882 }
  0xb4   : > { %vm903_vm4 = vcmp.ne.s32.totalorder %v2191_v15, 0 }
  0xb6   : > { %1692 = vmatmul.mubr.msk.f32.vlgmr.msra.gmra.mxu0 %vm652_vm1, %v1561_v3  ;;  %1717 = vmatmul.mubr.msk.f32.vlgmr.msra.gmra.mxu1 %vm652_vm1, %v1561_v3 }
  0xb7   : > { %1694 = vmatprep.mubr.msk.f32.mxu0 %vm1880_vm0, %v1879_v1  ;;  %1719 = vmatprep.mubr.msk.f32.mxu1 %vm1880_vm0, %v1879_v1  ;;  %v2193_v17 = vpop.permute.xlu1 %1155  ;;  %v1153_v18 = vpop.permute.xlu0 %1152 }
  0xb8   : > { %vm1173_vm5 = vcmp.ne.s32.totalorder %v2193_v17, 0 }
  0xba   : > { %1695 = vmatmul.mubr.msk.f32.gmra.mxu0 %vm652_vm1, %v1562_v5  ;;  %1720 = vmatmul.mubr.msk.f32.gmra.mxu1 %vm652_vm1, %v1562_v5 }
  0xbb   : > { %1697 = vmatprep.mubr.msk.f32.mxu0 %vm1880_vm0, %v1879_v1  ;;  %1722 = vmatprep.mubr.msk.f32.mxu1 %vm1880_vm0, %v1879_v1  ;;  %v2195_v19 = vpop.permute.xlu1 %1197  ;;  %v1195_v20 = vpop.permute.xlu0 %1194 }
  0xbc   : > { %vm1214_vm2 = vcmp.eq.s32.totalorder %v2075_v49, %v1195_v20  ;;  %vm1215_vm6 = vcmp.eq.s32.totalorder %v2075_v49, %v2195_v19 }
  0xbe   : > { %1698 = vmatmul.mubr.msk.f32.gmra.mxu0 %vm652_vm1, %v1563_v7  ;;  %1723 = vmatmul.mubr.msk.f32.gmra.mxu1 %vm652_vm1, %v1563_v7 }
  0xbf   : > { %1700 = vmatprep.mubr.msk.f32.mxu0 %vm1880_vm0, %v1879_v1  ;;  %1725 = vmatprep.mubr.msk.f32.mxu1 %vm1880_vm0, %v1879_v1  ;;  %v2197_v21 = vpop.permute.xlu1 %1239  ;;  %v1237_v22 = vpop.permute.xlu0 %1236 }
  0xc0   : > { %vm1256_vm3 = vcmp.eq.s32.totalorder %v2075_v49, %v1237_v22  ;;  %vm1257_vm7 = vcmp.eq.s32.totalorder %v2075_v49, %v2197_v21 }
  0xc2   : > { %1701 = vmatmul.mubr.msk.f32.gmra.mxu0 %vm652_vm1, %v1564_v9  ;;  %1726 = vmatmul.mubr.msk.f32.gmra.mxu1 %vm652_vm1, %v1564_v9 }
  0xc3   : > { %1703 = vmatprep.mubr.msk.f32.mxu0 %vm1880_vm0, %v1879_v1  ;;  %1728 = vmatprep.mubr.msk.f32.mxu1 %vm1880_vm0, %v1879_v1  ;;  %v2199_v23 = vpop.permute.xlu1 %1158  ;;  %v2201_v24 = vpop.permute.xlu0 %888 }
  0xc4   : > { %vm904_vm8 = vcmp.ne.s32.totalorder %v2201_v24, 0  ;;  %vm1174_vm9 = vcmp.ne.s32.totalorder %v2199_v23, 0 }
  0xc6   : > { %1704 = vmatmul.mubr.msk.f32.gmra.mxu0 %vm652_vm1, %v1565_v11  ;;  %1729 = vmatmul.mubr.msk.f32.gmra.mxu1 %vm652_vm1, %v1565_v11 }
  0xc7   : > { %1706 = vmatprep.mubr.msk.f32.mxu0 %vm1880_vm0, %v1879_v1  ;;  %1731 = vmatprep.mubr.msk.f32.mxu1 %vm1880_vm0, %v1879_v1  ;;  %v2203_v26 = vpop.permute.xlu1 %1242  ;;  %v2205_v27 = vpop.permute.xlu0 %1200 }
  0xc8   : > { %vm1258_vm10 = vcmp.eq.s32.totalorder %v2075_v49, %v2203_v26  ;;  %vm1216_vm11 = vcmp.eq.s32.totalorder %v2075_v49, %v2205_v27 }
  0xca   : > { %1707 = vmatmul.mubr.msk.f32.gmra.mxu0 %vm652_vm1, %v1566_v13  ;;  %1732 = vmatmul.mubr.msk.f32.gmra.mxu1 %vm652_vm1, %v1566_v13 }
  0xcb   : > { %1709 = vmatprep.mubr.msk.f32.mxu0 %vm1880_vm0, %v1879_v1  ;;  %1734 = vmatprep.mubr.msk.f32.mxu1 %vm1880_vm0, %v1879_v1  ;;  %v2207_v34 = vpop.permute.xlu1 %1161  ;;  %v2209_v35 = vpop.permute.xlu0 %891  ;;  %vm902_vm0 = vcmp.ne.s32.totalorder %v883_v16, 0 }
  0xcc   : > { %vm905_vm12 = vcmp.ne.s32.totalorder %v2209_v35, 0  ;;  %vm1175_vm13 = vcmp.ne.s32.totalorder %v2207_v34, 0 }
  0xce   : > { %1710 = vmatmul.mubr.msk.f32.gmra.mxu0 %vm652_vm1, %v1567_v14  ;;  %1735 = vmatmul.mubr.msk.f32.gmra.mxu1 %vm652_vm1, %v1567_v14  ;;  %vm1172_vm1 = vcmp.ne.s32.totalorder %v1153_v18, 0 }
  0xcf   : > { %v2215_v42 = vpop.permute.xlu1 %1245  ;;  %v2217_v43 = vpop.permute.xlu0 %1203 }
  0xd0   : > { %vm1259_vm14 = vcmp.eq.s32.totalorder %v2075_v49, %v2215_v42  ;;  %vm1217_vm15 = vcmp.eq.s32.totalorder %v2075_v49, %v2217_v43 }
  0xd3   : > { %v2223_v51 = vpop.permute.xlu1 %1164  ;;  %v2225_v52 = vpop.permute.xlu0 %894 }
  0xd7   : > { %v2235_v60 = vpop.permute.xlu1 %1248  ;;  %v2237_v61 = vpop.permute.xlu0 %1206 }
  0xdb   : > { %v2242_v10 = vpop.permute.xlu1 %1167  ;;  %v2244_v11 = vpop.permute.xlu0 %897 }
  0xdf   : > { %v1252_v21 = vpop.permute.xlu1 %1251  ;;  %v1210_v24 = vpop.permute.xlu0 %1209 }
 0x15a   : > { %v740_v1 = vpop.f32.mrf.mxu0  ;;  %v840_v25 = vpop.f32.mrf.mxu1 }
 0x15b   : > { %v909_v57 = vmin.f32 %v740_v1, %v840_v25 }
 0x15c   : > { %v1643_v28 = vpop.f32.mrf.mxu0  ;;  %v1668_v29 = vpop.f32.mrf.mxu1 }
 0x15d   : > { %v916_v2 = vsel %vm902_vm0, %v909_v57, %v740_v1  ;;  %vm906_vm0 = vcmp.ne.s32.totalorder %v2225_v52, 0 }
 0x15e   : > { %v745_v30 = vpop.f32.mrf.mxu0  ;;  %v845_v31 = vpop.f32.mrf.mxu1  ;;  %v1263_v9 = vsel %vm1256_vm3, %v916_v2, 0.0  ;;  %vm1218_vm3 = vcmp.eq.s32.totalorder %v2075_v49, %v2237_v61 }
 0x15f   : > { %v910_v0 = vmin.f32 %v745_v30, %v845_v31 }
 0x160   : > { %v1646_v32 = vpop.f32.mrf.mxu0  ;;  %v1671_v33 = vpop.f32.mrf.mxu1 }
 0x161   : > { %v917_v14 = vsel %vm903_vm4, %v910_v0, %v745_v30  ;;  %vm907_vm4 = vcmp.ne.s32.totalorder %v2244_v11, 0 }
 0x162   : > { %v750_v36 = vpop.f32.mrf.mxu0  ;;  %v850_v37 = vpop.f32.mrf.mxu1  ;;  %v1264_v25 = vsel %vm1257_vm7, %v917_v14, 0.0  ;;  %vm1219_vm7 = vcmp.eq.s32.totalorder %v2075_v49, %v1210_v24 }
 0x163   : > { %v911_v12 = vmin.f32 %v750_v36, %v850_v37 }
 0x164   : > { %v1649_v38 = vpop.f32.mrf.mxu0  ;;  %v1674_v39 = vpop.f32.mrf.mxu1 }
 0x165   : > { %v918_v29 = vsel %vm904_vm8, %v911_v12, %v750_v36 }
 0x166   : > { %v2211_v40 = vpop.f32.mrf.mxu0  ;;  %v2213_v41 = vpop.f32.mrf.mxu1  ;;  %v1265_v36 = vsel %vm1258_vm10, %v918_v29, 0.0 }
 0x167   : > { %v912_v28 = vmin.f32 %v2211_v40, %v2213_v41 }
 0x168   : > { %v1652_v44 = vpop.f32.mrf.mxu0  ;;  %v1677_v45 = vpop.f32.mrf.mxu1 }
 0x169   : > { %v919_v39 = vsel %vm905_vm12, %v912_v28, %v2211_v40  ;;  %v901_v40 = vpop.permute.xlu0 %900  ;;  %vm1298_vm12 = vcmask 7168  }
 0x16a   : > { %v2219_v46 = vpop.f32.mrf.mxu0  ;;  %v2221_v47 = vpop.f32.mrf.mxu1  ;;  %vm908_vm8 = vcmp.ne.s32.totalorder %v901_v40, 0 }
 0x16b   : > { %v913_v23 = vmin.f32 %v2219_v46, %v2221_v47  ;;  %v1266_v47 = vsel %vm1259_vm14, %v919_v39, 0.0 }
 0x16c   : > { %v1655_v48 = vpop.f32.mrf.mxu0  ;;  %v1680_v50 = vpop.f32.mrf.mxu1 }
 0x16d   : > { %v1171_v48 = vpop.permute.xlu1 %1170  ;;  %v1213_v2 = vpop.permute.xlu0 %1212 }
 0x16e   : > { %v2227_v53 = vpop.f32.mrf.mxu0  ;;  %v2229_v54 = vpop.f32.mrf.mxu1 }
 0x16f   : > { %v914_v34 = vmin.f32 %v2227_v53, %v2229_v54 }
 0x170   : > { %v1658_v55 = vpop.f32.mrf.mxu0  ;;  %v1683_v56 = vpop.f32.mrf.mxu1 }
 0x171   : > { %v920_v55 = vsel %vm906_vm0, %v913_v23, %v2219_v46  ;;  %v1255_v61 = vpop.permute.xlu1 %1254 }
 0x172   : > { %v2231_v58 = vpop.f32.mrf.mxu0  ;;  %v2233_v59 = vpop.f32.mrf.mxu1  ;;  %vm1262_vm10 = vcmp.eq.s32.totalorder %v2075_v49, %v1255_v61 }
 0x173   : > { %v915_v46 = vmin.f32 %v2231_v58, %v2233_v59 }
 0x174   : > { %v1661_v62 = vpop.f32.mrf.mxu0  ;;  %v1686_v63 = vpop.f32.mrf.mxu1 }
 0x175   : > { %v921_v63 = vsel %vm907_vm4, %v914_v34, %v2227_v53  ;;  %v922_v53 = vsel %vm908_vm8, %v915_v46, %v2231_v58 }
 0x176   : > { %v1010_v3 = vpop.f32.mrf.mxu0  ;;  %v1110_v4 = vpop.f32.mrf.mxu1  ;;  %v1269_v14 = vsel %vm1262_vm10, %v922_v53, 0.0 }
 0x177   : > { %v1179_v5 = vsel %vm1172_vm1, %v1110_v4, %v1010_v3  ;;  %vm1176_vm1 = vcmp.ne.s32.totalorder %v2223_v51, 0 }
 0x178   : > { %v1693_v6 = vpop.f32.mrf.mxu0  ;;  %v1718_v7 = vpop.f32.mrf.mxu1  ;;  %v1221_v8 = vsel %vm1214_vm2, %v1179_v5, 0.0  ;;  %vm1260_vm2 = vcmp.eq.s32.totalorder %v2075_v49, %v2235_v60 }
 0x179   : > { %v1270_v13 = vsub.f32 %v1221_v8, %v1263_v9  ;;  %v1267_v62 = vsel %vm1260_vm2, %v920_v55, 0.0 }
 0x17a   : > { %v1015_v16 = vpop.f32.mrf.mxu0  ;;  %v1115_v18 = vpop.f32.mrf.mxu1 }
 0x17b   : > { %v1180_v15 = vsel %vm1173_vm5, %v1115_v18, %v1015_v16  ;;  %1277 = vadd.xlane.f32.xlu0 %v1270_v13  ;;  %vm1177_vm5 = vcmp.ne.s32.totalorder %v2242_v10, 0 }
 0x17c   : > { %v1696_v20 = vpop.f32.mrf.mxu0  ;;  %v1721_v22 = vpop.f32.mrf.mxu1  ;;  %v1222_v1 = vsel %vm1215_vm6, %v1180_v15, 0.0  ;;  %vm1261_vm6 = vcmp.eq.s32.totalorder %v2075_v49, %v1252_v21 }
 0x17d   : > { %v1271_v17 = vsub.f32 %v1222_v1, %v1264_v25  ;;  %v1268_v59 = vsel %vm1261_vm6, %v921_v63, 0.0 }
 0x17e   : > { %v1020_v30 = vpop.f32.mrf.mxu0  ;;  %v1120_v19 = vpop.f32.mrf.mxu1 }
 0x17f   : > { %v1181_v31 = vsel %vm1174_vm9, %v1120_v19, %v1020_v30  ;;  %1279 = vadd.xlane.f32.xlu1 %v1271_v17  ;;  %vm1178_vm9 = vcmp.ne.s32.totalorder %v1171_v48, 0 }
 0x180   : > { %v1699_v32 = vpop.f32.mrf.mxu0  ;;  %v1724_v33 = vpop.f32.mrf.mxu1  ;;  %v1223_v37 = vsel %vm1216_vm11, %v1181_v31, 0.0  ;;  %vm1220_vm11 = vcmp.eq.s32.totalorder %v2075_v49, %v1213_v2 }
 0x181   : > { %v1272_v38 = vsub.f32 %v1223_v37, %v1265_v36 }
 0x182   : > { %v1025_v26 = vpop.f32.mrf.mxu0  ;;  %v1125_v27 = vpop.f32.mrf.mxu1 }
 0x183   : > { %v1182_v35 = vsel %vm1175_vm13, %v1125_v27, %v1025_v26  ;;  %1281 = vadd.xlane.f32.xlu0 %v1272_v38 }
 0x184   : > { %v1702_v41 = vpop.f32.mrf.mxu0  ;;  %v1727_v44 = vpop.f32.mrf.mxu1  ;;  %v1224_v45 = vsel %vm1217_vm15, %v1182_v35, 0.0 }
 0x185   : > { %v1273_v50 = vsub.f32 %v1224_v45, %v1266_v47 }
 0x186   : > { %v1030_v42 = vpop.f32.mrf.mxu0  ;;  %v1130_v43 = vpop.f32.mrf.mxu1 }
 0x187   : > { %v1183_v52 = vsel %vm1176_vm1, %v1130_v43, %v1030_v42  ;;  %1283 = vadd.xlane.f32.xlu0 %v1273_v50 }
 0x188   : > { %v1705_v56 = vpop.f32.mrf.mxu0  ;;  %v1730_v57 = vpop.f32.mrf.mxu1  ;;  %v1225_v54 = vsel %vm1218_vm3, %v1183_v52, 0.0 }
 0x189   : > { %v1274_v51 = vsub.f32 %v1225_v54, %v1267_v62 }
 0x18a   : > { %v1035_v60 = vpop.f32.mrf.mxu0  ;;  %v1135_v0 = vpop.f32.mrf.mxu1 }
 0x18b   : > { %v1184_v3 = vsel %vm1177_vm5, %v1135_v0, %v1035_v60  ;;  %1285 = vadd.xlane.f32.xlu1 %v1274_v51 }
 0x18c   : > { %v1708_v4 = vpop.f32.mrf.mxu0  ;;  %v1733_v5 = vpop.f32.mrf.mxu1  ;;  %v1226_v6 = vsel %vm1219_vm7, %v1184_v3, 0.0 }
 0x18d   : > { %v1275_v7 = vsub.f32 %v1226_v6, %v1268_v59 }
 0x18e   : > { %v1040_v8 = vpop.f32.mrf.mxu0  ;;  %v1140_v9 = vpop.f32.mrf.mxu1 }
 0x18f   : > { %v1185_v10 = vsel %vm1178_vm9, %v1140_v9, %v1040_v8  ;;  %1287 = vadd.xlane.f32.xlu0 %v1275_v7 }
 0x190   : > { %v1711_v11 = vpop.f32.mrf.mxu0  ;;  %v1736_v12 = vpop.f32.mrf.mxu1  ;;  %v1227_v13 = vsel %vm1220_vm11, %v1185_v10, 0.0 }
 0x191   : > { %v1276_v16 = vsub.f32 %v1227_v13, %v1269_v14 }
 0x193   : > { %1289 = vadd.xlane.f32.xlu1 %v1276_v16 }
 0x204   : > { %v1278_v18 = vpop.xlane.xlu0 %1277 }
 0x205   : > { %v1291_v1 = vand.u32 2147483647, %v1278_v18 }
 0x207   : > { %v1299_v29 = vsel %vm1298_vm12, %v1291_v1, 0.0 }
 0x208   : > { %v1280_v15 = vpop.xlane.xlu1 %1279 }
 0x209   : > { %v1292_v22 = vand.u32 2147483647, %v1280_v15 }
 0x20b   : > { %v1300_v28 = vsel %vm1298_vm12, %v1292_v22, 0.0 }
 0x20c   : > { %v1282_v20 = vpop.xlane.xlu0 %1281  ;;  %v1301_v21 = vadd.f32 %v1300_v28, %v1299_v29 }
 0x20d   : > { %v1293_v25 = vand.u32 2147483647, %v1282_v20 }
 0x20f   : > { %v1302_v30 = vsel %vm1298_vm12, %v1293_v25, 0.0 }
 0x210   : > { %v1284_v58 = vpop.xlane.xlu0 %1283  ;;  %v1303_v31 = vadd.f32 %v1302_v30, %v1301_v21 }
 0x211   : > { %v1294_v17 = vand.u32 2147483647, %v1284_v58 }
 0x213   : > { %v1304_v24 = vsel %vm1298_vm12, %v1294_v17, 0.0 }
 0x214   : > { %v1286_v49 = vpop.xlane.xlu1 %1285  ;;  %v1305_v36 = vadd.f32 %v1304_v24, %v1303_v31 }
 0x215   : > { %v1295_v19 = vand.u32 2147483647, %v1286_v49 }
 0x217   : > { %v1306_v33 = vsel %vm1298_vm12, %v1295_v19, 0.0 }
 0x218   : > { %v1288_v32 = vpop.xlane.xlu0 %1287  ;;  %v1307_v38 = vadd.f32 %v1306_v33, %v1305_v36 }
 0x219   : > { %v1296_v37 = vand.u32 2147483647, %v1288_v32 }
 0x21b   : > { %v1308_v23 = vsel %vm1298_vm12, %v1296_v37, 0.0 }
 0x21c   : > { %v1290_v39 = vpop.xlane.xlu1 %1289  ;;  %v1309_v27 = vadd.f32 %v1308_v23, %v1307_v38 }
 0x21d   : > { %v1297_v26 = vand.u32 2147483647, %v1290_v39 }
 0x21f   : > { %v1310_v35 = vsel %vm1298_vm12, %v1297_v26, 0.0 }
 0x220   : > { %v1311_v41 = vadd.f32 %v1310_v35, %v1309_v27 }
 0x222   : > { %1312 = vadd.xlane.f32.xlu0 %v1311_v41 }
 0x2ab   : > { %v1313_v44 = vpop.xlane.xlu0 %1312 }
 0x2ac   : > { %v1314_v45 = vrot.slane %v1313_v44, 4 }
 0x2ae   : > { %v1315_v47 = vadd.f32 %v1314_v45, %v1313_v44 }
 0x2b0   : > { %v1316_v48 = vrot.slane %v1315_v47, 2 }
 0x2b2   : > { %v1317_v40 = vadd.f32 %v1316_v48, %v1315_v47 }
 0x2b4   : > { %v1318_v34 = vrot.slane %v1317_v40, 1 }
 0x2b6   : > { %v1319_v50 = vadd.f32 %v1318_v34, %v1317_v40 }
 0x2b8   : > { %1738 = vpush %v1319_v50 }
 0x2e9   : > { %s1739_s14 = spop %1738 }
 0x2ea   : > { %v1321_v55 = vstv %s1739_s14 }
 0x2eb   : > { %1322 = vst [vmem:[%s481_s26] sm:$0x1] %v1321_v55 }
 0x2ec   : > { %1813 = shalt.err (!%p1810_p6)
}
 0x2ed   : > { %s1814_s0 = scalar_lea.hbm %s1335_s22, 16  ;;  %s1818_s12 = scalar_lea.hbm %s2347_s8, 32 }
 0x2ee   : > { %p1815_p7 = scmp.ne.s32.totalorder %s1335_s22, %s1814_s0  ;;  %p1819_p11 = scmp.lt.s32.totalorder %s1335_s22, %s2347_s8 }
 0x2ef   : > { %p1820_p12 = scmp.lt.s32.totalorder %s1818_s12, %s1814_s0 }
 0x2f0   : > { %p1816_p9 = pnand %p1815_p7, %p1967_p4 }
 0x2f1   : > { %p1821_p13 = por %p1820_p12, %p1819_p11 }
 0x2f2   : > { %p1817_p10 = pneg %p1816_p9 }
 0x2f4   : > { %p1822_p0 = pnand %p1821_p13, %p1817_p10 }
 0x2f6   : > { %1825 = shalt.err (!%p1822_p0)
}
 0x2f7   : > { %1740 = dma.vmem_to_hbm [thread:$0]  (%p1967_p4), %s2296_s11, 16, %s1335_s22, %s1324_s23  }
 0x2f8 PF: > { %p1746_p1 = scmp.ge.s32.totalorder %s1876_s10, 2  ;;  %s1349_s19 = sand.u32 1, %s1856_s27  }
 0x2f9   : > { %s1350_s24 = scalar_lea.sflag [#allocation3], %s1349_s19 }
 0x2fa   : > { %p1743_p2 = pnand %p1746_p1, %p1974_p8 }
 0x2fc   : > { %p1744_p3 = pneg %p1743_p2 }
 0x2fe   : > { %1851 = dma.done.wait (%p1744_p3), %s1350_s24, 16  }
 0x2ff   : > { %1853 = vsyncadd (%p1744_p3), %s1350_s24, 4294967280  ;;  %s21_s10 = sadd.s32 1, %s1876_s10   ;;  %s2352_s27 = smov %s1860_s28 }
 0x300   : > { %p18_p5 = scmp.ge.s32.totalorder %s21_s10, 4   ;;  %s2353_s28 = smov %s1864_s29 }
 0x301   : > { %s2354_s29 = smov %s1980_s18  ;;  %s2355_s30 = smov %s1872_s9 }
 0x302   : > { %s2356_s9 = smov %s2358_s13  ;;  %20 = sbr.rel (!%p18_p5) target bundleno = 6 (0x6), region = 108 }
 0x307   :  { %1354 = vsyncpa [#allocation3], 1 }
 0x308   :  { %1356 = vsyncpa [#allocation3 + $0x1], 1 }

</bundles_post_ra>
